<compile_context>
chip_gen: v6e
topology: v6e:2x2x1
jax: 0.10.0
libtpu: 0.0.40
codegen_flags: <defaults>
</compile_context>

<pallas_src>
import functools

import jax
import jax.numpy as jnp
from jax import lax
from jax.experimental import pallas as pl
from jax.experimental.pallas import tpu as pltpu

_LANES = 128
_MAX_TILE_ROWS = 2048   # 2048*128*4B = 1 MiB per input per buffer.


def _dice_partial_kernel(x_ref, t_ref, out_ref, *, total, tile_rows, mask_tail):
    x = x_ref[...].astype(jnp.float32)          # (tile_rows, 128) logits
    t = t_ref[...].astype(jnp.float32)          # (tile_rows, 128) targets
    s = jax.nn.sigmoid(x)

    if mask_tail:
        # Only emitted when the flattened size does not divide the tile evenly.
        i = pl.program_id(0)
        row_ids = lax.broadcasted_iota(jnp.int32, x.shape, 0)
        col_ids = lax.broadcasted_iota(jnp.int32, x.shape, 1)
        flat = (i * tile_rows + row_ids) * _LANES + col_ids
        valid = flat < total
        s = jnp.where(valid, s, 0.0)
        t = jnp.where(valid, t, 0.0)

    inter = jnp.sum(s * t, axis=0, keepdims=True)   # (1, 128) lane partials
    s_sum = jnp.sum(s, axis=0, keepdims=True)       # (1, 128)
    t_sum = jnp.sum(t, axis=0, keepdims=True)       # (1, 128)
    out_ref[...] = jnp.concatenate([inter, s_sum, t_sum], axis=0)[None]  # (1,3,128)


def dice_loss(inputs, target, *, smooth=0.01):
    """Pallas DiceLoss. inputs: logits (any shape); target: same shape."""
    total = int(inputs.size)
    xf = inputs.astype(jnp.float32).reshape(-1)
    tf = target.astype(jnp.float32).reshape(-1)

    rows_needed = -(-total // _LANES)
    tile_rows = min(_MAX_TILE_ROWS, max(8, ((rows_needed + 7) // 8) * 8))
    num_blocks = -(-rows_needed // tile_rows)
    padded_rows = num_blocks * tile_rows
    pad = padded_rows * _LANES - total
    if pad:
        xf = jnp.pad(xf, (0, pad))
        tf = jnp.pad(tf, (0, pad))
    x2 = xf.reshape(padded_rows, _LANES)
    t2 = tf.reshape(padded_rows, _LANES)

    kernel = functools.partial(
        _dice_partial_kernel, total=total, tile_rows=tile_rows, mask_tail=pad > 0
    )

    partials = pl.pallas_call(
        kernel,
        out_shape=jax.ShapeDtypeStruct((num_blocks, 3, _LANES), jnp.float32),
        grid=(num_blocks,),
        in_specs=[
            pl.BlockSpec((tile_rows, _LANES), lambda i: (i, 0)),
            pl.BlockSpec((tile_rows, _LANES), lambda i: (i, 0)),
        ],
        out_specs=pl.BlockSpec((1, 3, _LANES), lambda i: (i, 0, 0)),
        compiler_params=pltpu.CompilerParams(dimension_semantics=("parallel",)),
    )(x2, t2)

    sums = jnp.sum(partials, axis=(0, 2))           # (3,) tiny XLA reduction
    intersect, input_sum, target_sum = sums[0], sums[1], sums[2]
    dice = (2.0 * intersect + smooth) / (input_sum + target_sum + smooth)
    return 1.0 - dice


def _reference(inputs, target, smooth=0.01):
    s = jax.nn.sigmoid(inputs.astype(jnp.float32))
    t = target.astype(jnp.float32)
    intersect = jnp.sum(s * t)
    union = jnp.sum(s) + jnp.sum(t)
    return 1.0 - (2.0 * intersect + smooth) / (union + smooth)


if __name__ == "__main__":
    key = jax.random.PRNGKey(0)
    k1, k2 = jax.random.split(key)

    B, C, H, W = 2, 4, 16, 16
    logits = jax.random.normal(k1, (B, C, H, W), dtype=jnp.float32)
    target = (jax.random.uniform(k2, (B, C, H, W)) > 0.5).astype(jnp.float32)

    out = dice_loss(logits, target, smooth=0.01)
    out = jax.block_until_ready(out)

    ref = _reference(logits, target, smooth=0.01)
    assert jnp.allclose(out, ref, rtol=1e-5, atol=1e-6), (out, ref)

    print("KERNEL_OK")
</pallas_src>

<mosaic_0001>
module attributes {stable_mosaic.version = 11 : i64} {
  func.func @_dice_partial_kernel(%arg0: i32, %arg1: memref<16x128xf32, #tpu.memory_space<vmem>>, %arg2: memref<16x128xf32, #tpu.memory_space<vmem>>, %arg3: memref<1x3x128xf32, #tpu.memory_space<vmem>>) attributes {dimension_semantics = [#tpu.dimension_semantics<parallel>], iteration_bounds = array<i64: 1>, scalar_prefetch = 0 : i64, scratch_operands = 0 : i64, tpu.core_type = #tpu.core_type<tc>, window_params = [{transform_indices = @transform_0, window_bounds = array<i64: 16, 128>}, {transform_indices = @transform_1, window_bounds = array<i64: 16, 128>}, {transform_indices = @transform_2, window_bounds = array<i64: 1, 3, 128>}]} {
    %c0 = arith.constant 0 : index
    %c0_0 = arith.constant 0 : index
    %0 = vector.load %arg1[%c0, %c0_0] : memref<16x128xf32, #tpu.memory_space<vmem>>, vector<16x128xf32>
    %c0_1 = arith.constant 0 : index
    %c0_2 = arith.constant 0 : index
    %1 = vector.load %arg2[%c0_1, %c0_2] : memref<16x128xf32, #tpu.memory_space<vmem>>, vector<16x128xf32>
    %2 = arith.negf %0 : vector<16x128xf32>
    %3 = math.exp %2 : vector<16x128xf32>
    %cst = arith.constant 1.000000e+00 : f32
    %4 = vector.broadcast %cst : f32 to vector<16x128xf32>
    %5 = arith.addf %4, %3 : vector<16x128xf32>
    %6 = arith.divf %4, %5 : vector<16x128xf32>
    %7 = arith.mulf %6, %1 : vector<16x128xf32>
    %cst_3 = arith.constant dense<0.000000e+00> : vector<128xf32>
    %8 = vector.multi_reduction <add>, %7, %cst_3 [0] : vector<16x128xf32> to vector<128xf32>
    %9 = vector.shape_cast %8 : vector<128xf32> to vector<1x128xf32>
    %cst_4 = arith.constant dense<0.000000e+00> : vector<128xf32>
    %10 = vector.multi_reduction <add>, %6, %cst_4 [0] : vector<16x128xf32> to vector<128xf32>
    %11 = vector.shape_cast %10 : vector<128xf32> to vector<1x128xf32>
    %cst_5 = arith.constant dense<0.000000e+00> : vector<128xf32>
    %12 = vector.multi_reduction <add>, %1, %cst_5 [0] : vector<16x128xf32> to vector<128xf32>
    %13 = vector.shape_cast %12 : vector<128xf32> to vector<1x128xf32>
    %14 = tpu.concatenate %9, %11, %13 in 0 : vector<1x128xf32>, vector<1x128xf32>, vector<1x128xf32> -> vector<3x128xf32>
    %15 = vector.shape_cast %14 : vector<3x128xf32> to vector<1x3x128xf32>
    %c0_6 = arith.constant 0 : index
    %c0_7 = arith.constant 0 : index
    %c0_8 = arith.constant 0 : index
    %16 = vector.load %arg3[%c0_6, %c0_7, %c0_8] : memref<1x3x128xf32, #tpu.memory_space<vmem>>, vector<1x3x128xf32>
    tpu.vector_store %arg3[%c0_6, %c0_7, %c0_8], %15 {strides = array<i32>} : memref<1x3x128xf32, #tpu.memory_space<vmem>>, vector<1x3x128xf32>,
    return
  }
  func.func @transform_0(%arg0: i32) -> (i32, i32) {
    %c0_i32 = arith.constant 0 : i32
    %c0_i32_0 = arith.constant 0 : i32
    return %arg0, %c0_i32 : i32, i32
  }
  func.func @transform_1(%arg0: i32) -> (i32, i32) {
    %c0_i32 = arith.constant 0 : i32
    %c0_i32_0 = arith.constant 0 : i32
    return %arg0, %c0_i32 : i32, i32
  }
  func.func @transform_2(%arg0: i32) -> (i32, i32, i32) {
    %c0_i32 = arith.constant 0 : i32
    %c0_i32_0 = arith.constant 0 : i32
    %c0_i32_1 = arith.constant 0 : i32
    return %arg0, %c0_i32, %c0_i32_0 : i32, i32, i32
  }
}

</mosaic_0001>

<bundles_post_ra>
// kernel: tpu_custom_call.1
= control target key start
LH: loop header
LB: loop body
LE: loop exit
PB: predicated region body
PF: predicated region fallthrough
CT: control target
= control target key end

     0   :  { %7 = vsyncpa [#allocation3], 0  ;;  %s175_s0 = inlined_call_operand.hbm [shape: f32[16,128], index: 0, kind: input, shape index: {}]   ;;  %s176_s1 = inlined_call_operand.hbm [shape: f32[16,128], index: 1, kind: input, shape index: {}]   ;;  %s177_s2 = inlined_call_operand.vmem [shape: f32[1,3,128], index: 2, kind: output, shape index: {}]  }
   0x1   :  { %8 = vsyncpa [#allocation5], 0  ;;  %s147_s9 = smov [#allocation2]  }
   0x2   :  { %s14_s10 = sshll.u32 %s147_s9, 4  ;;  %s15_s10 = int_to_ptr.vmem [resolvable:$true] %s14_s10 }
   0x3   :  { %s111_s11 = scalar_lea.vmem %s15_s10, 256  ;;  %p116_p1 = scmp.lt.s32.totalorder %s15_s10, %s15_s10 }
   0x4   :  { %p112_p0 = scmp.ne.s32.totalorder %s15_s10, %s111_s11  ;;  %p117_p2 = scmp.lt.s32.totalorder %s111_s11, %s111_s11 }
   0x6   :  { %p118_p3 = por %p117_p2, %p116_p1 }
   0x8   :  { %p119_p4 = pnand %p118_p3, %p112_p0 }
   0xa   :  { %122 = shalt.err (!%p119_p4)
}
   0xb   :  { %s148_s12 = smov 128   ;;  %s149_s13 = smov 8  }
   0xc   :  { %20 = dma.hbm_to_vmem [thread:$0]  %s175_s0, 256, %s15_s10, [#allocation3], %s148_s12, %s148_s12, %s149_s13  }
   0xd   :  { %s150_s16 = smov [#allocation4]  }
   0xe   :  { %s26_s17 = sshll.u32 %s150_s16, 4  ;;  %s27_s17 = int_to_ptr.vmem [resolvable:$true] %s26_s17 }
   0xf   :  { %s131_s18 = scalar_lea.vmem %s27_s17, 256  ;;  %p136_p6 = scmp.lt.s32.totalorder %s27_s17, %s27_s17 }
  0x10   :  { %p132_p5 = scmp.ne.s32.totalorder %s27_s17, %s131_s18  ;;  %p137_p7 = scmp.lt.s32.totalorder %s131_s18, %s131_s18 }
  0x12   :  { %p138_p8 = por %p137_p7, %p136_p6 }
  0x14   :  { %p139_p9 = pnand %p138_p8, %p132_p5 }
  0x16   :  { %142 = shalt.err (!%p139_p9)
}
  0x17   :  { %32 = dma.hbm_to_vmem [thread:$0]  %s176_s1, 256, %s27_s17, [#allocation5], %s148_s12, %s148_s12, %s149_s13  }
  0x18   :  { %143 = dma.done.wait [#allocation3], 256  }
  0x19   :  { %144 = vsyncadd [#allocation3], 4294967040 }
  0x1a   :  { %145 = dma.done.wait [#allocation5], 256  }
  0x1b   :  { %146 = vsyncadd [#allocation5], 4294967040  ;;  %v39_v0 = vld [vmem:[#allocation2] sm:$0xff]  ;;  %v40_v1 = vld [vmem:[#allocation2 + $0x8] sm:$0xff]  ;;  %vm78_vm0 = vcmask 1040384   ;;  %vm80_vm1 = vcmask 1041408  }
  0x1c   :  { %v89_v2 = vmul.f32 -1.442695, %v39_v0  ;;  %v90_v3 = vmul.f32 -1.442695, %v40_v1  ;;  %v41_v8 = vld [vmem:[#allocation4] sm:$0xff]  ;;  %v42_v9 = vld [vmem:[#allocation4 + $0x8] sm:$0xff] }
  0x1d   :  { %v71_v10 = vadd.f32 %v42_v9, %v41_v8 }
  0x1e   :  { %95 = vpow2.f32 %v89_v2 }
  0x1f   :  { %97 = vpow2.f32 %v90_v3  ;;  %v72_v11 = vrot.slane %v71_v10, 4 }
  0x21   :  { %v73_v12 = vadd.f32 %v72_v11, %v71_v10 }
  0x23   :  { %v74_v18 = vrot.slane %v73_v12, 2 }
  0x25   :  { %v75_v23 = vadd.f32 %v74_v18, %v73_v12 }
  0x27   :  { %v76_v28 = vrot.slane %v75_v23, 1 }
  0x29   :  { %v77_v33 = vadd.f32 %v76_v28, %v75_v23 }
  0x2b   :  { %v96_v4 = vpop.eup %95 }
  0x2c   :  { %v98_v5 = vpop.eup %97  ;;  %v49_v6 = vadd.f32 1.0, %v96_v4 }
  0x2d   :  { %v50_v7 = vadd.f32 1.0, %v98_v5 }
  0x2e   :  { %99 = vrcp.f32 %v49_v6 }
  0x2f   :  { %101 = vrcp.f32 %v50_v7 }
  0x3b   :  { %v100_v13 = vpop.eup %99 }
  0x3c   :  { %v102_v14 = vpop.eup %101  ;;  %v55_v15 = vmul.f32 %v100_v13, %v41_v8 }
  0x3d   :  { %v56_v16 = vmul.f32 %v102_v14, %v42_v9  ;;  %v64_v17 = vadd.f32 %v102_v14, %v100_v13 }
  0x3f   :  { %v57_v19 = vadd.f32 %v56_v16, %v55_v15  ;;  %v65_v20 = vrot.slane %v64_v17, 4 }
  0x41   :  { %v58_v21 = vrot.slane %v57_v19, 4  ;;  %v66_v22 = vadd.f32 %v65_v20, %v64_v17 }
  0x43   :  { %v59_v24 = vadd.f32 %v58_v21, %v57_v19  ;;  %v67_v25 = vrot.slane %v66_v22, 2 }
  0x45   :  { %v60_v26 = vrot.slane %v59_v24, 2  ;;  %v68_v27 = vadd.f32 %v67_v25, %v66_v22 }
  0x47   :  { %v61_v29 = vadd.f32 %v60_v26, %v59_v24  ;;  %v69_v30 = vrot.slane %v68_v27, 1 }
  0x49   :  { %v62_v31 = vrot.slane %v61_v29, 1  ;;  %v70_v32 = vadd.f32 %v69_v30, %v68_v27 }
  0x4b   :  { %v63_v34 = vadd.f32 %v62_v31, %v61_v29 }
  0x4d   :  { %v79_v35 = vsel %vm78_vm0, %v63_v34, %v70_v32 }
  0x4e   :  { %v81_v36 = vsel %vm80_vm1, %v79_v35, %v77_v33 }
  0x4f   :  { %82 = vst [vmem:[%s177_s2] sm:$0x7] %v81_v36 }
  0x50   :  { %87 = vsyncpa [#allocation3], 1 }
  0x51   :  { %88 = vsyncpa [#allocation5], 1 }

</bundles_post_ra>
